<compile_context>
chip_gen: v7x
topology: tpu7x:2x2x1
jax: 0.10.0
libtpu: 0.0.40
codegen_flags: <defaults>
</compile_context>

<pallas_src>
import functools

import jax
import jax.numpy as jnp
from jax import lax
from jax.experimental import pallas as pl
from jax.experimental.pallas import tpu as pltpu


def _round_up(x, mult):
    return ((x + mult - 1) // mult) * mult


def _vmem_budget_bytes():
    """Generation-aware VMEM budget (v5e/v6e: 128 MiB, v7x: 64 MiB per TC)."""
    try:
        cap = int(pltpu.get_tpu_info().vmem_capacity_bytes)
    except Exception:
        cap = 64 * 1024 * 1024
    cap = min(cap, 128 * 1024 * 1024)
    return (cap * 3) // 4  # leave headroom for the compiler


def _pick_tk(m, k128, budget_bytes):
    """Largest 128-multiple divisor of k128 whose double-buffered bf16 strip
    (2 * M * tk * 2B) fits the input budget; capped at 8192."""
    gram_bytes = 3 * m * m * 4 + (1 << 20)  # query gram (buffers) + acc scratch
    input_budget = max(budget_bytes - gram_bytes, 8 * 1024 * 1024)
    tk_cap = input_budget // (2 * m * 2)          # double-buffer, bf16 = 2 B
    tk_cap = max(128, min(8192, (tk_cap // 128) * 128))
    n128 = k128 // 128
    d_max = max(1, min(tk_cap // 128, n128))
    for d in range(d_max, 0, -1):
        if n128 % d == 0:
            return d * 128
    return 128


def _prep_features(feat):
    """(N, C, H, W) f32 -> bf16 (M, K128) with zero lane padding if needed."""
    n, c, h, w = feat.shape
    m = n * c
    k = h * w
    f = feat.reshape(m, k).astype(jnp.bfloat16)
    k128 = _round_up(k, 128)
    if k128 != k:
        # Zero padding does not change F @ F.T; under jit this fuses with the
        # cast, so no extra full-array HBM round trip.
        f = jnp.pad(f, ((0, 0), (0, k128 - k)))
    return f, m, k, k128


# ---------------------------------------------------------------------------
# Standalone Gram kernel (used once per layer for the cached query Gram).
# Single shared K strip, output resident across the K grid axis.
# ---------------------------------------------------------------------------
def _gram_kernel(f_ref, o_ref, *, inv_scale):
    kk = pl.program_id(0)

    @pl.when(kk == 0)
    def _():
        o_ref[...] = jnp.zeros_like(o_ref)

    a = f_ref[...]
    # A @ A.T via contraction of the last dims (no materialized transpose).
    o_ref[...] += lax.dot_general(
        a, a,
        dimension_numbers=(((1,), (1,)), ((), ())),
        preferred_element_type=jnp.float32,
    )

    @pl.when(kk == pl.num_programs(0) - 1)
    def _():
        o_ref[...] = o_ref[...] * inv_scale


def gram_matrix(feat):
    """feat (N, C, H, W) f32 -> (N*C, N*C) f32 Gram matrix (scaled by 1/NCHW)."""
    f, m, k, k128 = _prep_features(feat)
    budget = _vmem_budget_bytes()
    tk = _pick_tk(m, k128, budget)
    grid = (k128 // tk,)
    kernel = functools.partial(_gram_kernel, inv_scale=1.0 / float(m * k))
    return pl.pallas_call(
        kernel,
        out_shape=jax.ShapeDtypeStruct((m, m), jnp.float32),
        grid_spec=pltpu.PrefetchScalarGridSpec(
            num_scalar_prefetch=0,
            grid=grid,
            in_specs=[pl.BlockSpec((m, tk), lambda kk: (0, kk))],
            out_specs=pl.BlockSpec((m, m), lambda kk: (0, 0)),
        ),
        compiler_params=pltpu.CompilerParams(
            dimension_semantics=("arbitrary",),
            vmem_limit_bytes=budget,
        ),
        cost_estimate=pl.CostEstimate(
            flops=2 * m * m * k128,
            transcendentals=0,
            bytes_accessed=m * k128 * 2 + m * m * 4,
        ),
    )(f)


# ---------------------------------------------------------------------------
# Fused Gram + weighted-MSE kernel: accumulate S = F @ F.T over K into a VMEM
# scratch; at the last K step scale, subtract the cached query Gram and reduce
# the squared error into a single SMEM scalar.
# ---------------------------------------------------------------------------
def _gram_mse_kernel(f_ref, q_ref, loss_ref, acc_ref, *, inv_scale, mse_scale):
    kk = pl.program_id(0)

    @pl.when(kk == 0)
    def _():
        acc_ref[...] = jnp.zeros_like(acc_ref)
        loss_ref[0, 0] = jnp.float32(0.0)

    a = f_ref[...]
    acc_ref[...] += lax.dot_general(
        a, a,
        dimension_numbers=(((1,), (1,)), ((), ())),
        preferred_element_type=jnp.float32,
    )

    @pl.when(kk == pl.num_programs(0) - 1)
    def _():
        d = acc_ref[...] * inv_scale - q_ref[...]
        loss_ref[0, 0] = jnp.sum(d * d) * mse_scale


def style_loss_fused(feat, query_gram, *, weight):
    """weight * mean((gram(feat) - query_gram)^2), one fused Pallas kernel."""
    f, m, k, k128 = _prep_features(feat)
    budget = _vmem_budget_bytes()
    tk = _pick_tk(m, k128, budget)
    grid = (k128 // tk,)
    kernel = functools.partial(
        _gram_mse_kernel,
        inv_scale=1.0 / float(m * k),
        mse_scale=float(weight) / float(m * m),
    )
    loss = pl.pallas_call(
        kernel,
        out_shape=jax.ShapeDtypeStruct((1, 1), jnp.float32),
        grid_spec=pltpu.PrefetchScalarGridSpec(
            num_scalar_prefetch=0,
            grid=grid,
            in_specs=[
                pl.BlockSpec((m, tk), lambda kk: (0, kk)),
                pl.BlockSpec((m, m), lambda kk: (0, 0)),  # resident query Gram
            ],
            out_specs=pl.BlockSpec(memory_space=pltpu.MemorySpace.SMEM),
            scratch_shapes=[pltpu.VMEM((m, m), jnp.float32)],
        ),
        compiler_params=pltpu.CompilerParams(
            dimension_semantics=("arbitrary",),
            vmem_limit_bytes=budget,
        ),
        cost_estimate=pl.CostEstimate(
            flops=2 * m * m * k128 + 4 * m * m,
            transcendentals=0,
            bytes_accessed=m * k128 * 2 + m * m * 4 + 4,
        ),
    )(f, query_gram)
    return loss[0, 0]


_gram_matrix_jit = jax.jit(gram_matrix)
_style_loss_jit = jax.jit(style_loss_fused, static_argnames=("weight",))


# ---------------------------------------------------------------------------
# StyleLoss module (JAX/Pallas port of the PyTorch nn.Module).
# ---------------------------------------------------------------------------
class StyleLoss:
    def __init__(self, query_features):
        self.query_features = query_features
        self.style_weights = {
            "conv1_1": 1.5,
            "conv2_1": 1.0,
            "conv3_1": 0.5,
            "conv4_1": 0.25,
            "conv5_1": 0.25,
        }
        self._query_grams = {}  # query features are static -> cache their Gram

    def _query_gram(self, layer):
        if layer not in self._query_grams:
            self._query_grams[layer] = _gram_matrix_jit(self.query_features[layer])
        return self._query_grams[layer]

    def __call__(self, input, layer):
        query_gram = self._query_gram(layer)
        return _style_loss_jit(input, query_gram,
                               weight=self.style_weights[layer])


# ---------------------------------------------------------------------------
# Pure-JAX f32 reference for the correctness check.
# ---------------------------------------------------------------------------
def _gram_ref(feat):
    n, c, h, w = feat.shape
    f = feat.reshape(n * c, h * w).astype(jnp.float32)
    return (f @ f.T) / float(n * c * h * w)


def _style_loss_ref(input, query, weight):
    g_r = _gram_ref(input)
    g_q = _gram_ref(query)
    return jnp.mean((g_r - g_q) ** 2) * weight


if __name__ == "__main__":
    key = jax.random.PRNGKey(0)
    k1, k2, k3, k4 = jax.random.split(key, 4)

    # Case 1: batch=2, channels=4, spatial=16x16 (K = 256, lane aligned).
    shape1 = (2, 4, 16, 16)
    layer1 = "conv1_1"
    qf1 = {layer1: jax.random.normal(k1, shape1, dtype=jnp.float32)}
    x1 = jax.random.normal(k2, shape1, dtype=jnp.float32)
    sl1 = StyleLoss(qf1)
    loss1 = jax.block_until_ready(sl1(x1, layer1))
    ref1 = _style_loss_ref(x1, qf1[layer1], sl1.style_weights[layer1])
    assert jnp.isfinite(loss1), "loss1 is not finite"
    # bf16 MXU operands (f32 accumulate) -> relaxed tolerance vs f32 reference.
    assert jnp.allclose(loss1, ref1, rtol=5e-2, atol=1e-7), (loss1, ref1)

    # Case 2: K = 12*10 = 120 not lane aligned (exercises the zero-pad path).
    shape2 = (2, 4, 12, 10)
    layer2 = "conv2_1"
    qf2 = {layer2: jax.random.normal(k3, shape2, dtype=jnp.float32)}
    x2 = jax.random.normal(k4, shape2, dtype=jnp.float32)
    sl2 = StyleLoss(qf2)
    loss2 = jax.block_until_ready(sl2(x2, layer2))
    ref2 = _style_loss_ref(x2, qf2[layer2], sl2.style_weights[layer2])
    assert jnp.isfinite(loss2), "loss2 is not finite"
    assert jnp.allclose(loss2, ref2, rtol=5e-2, atol=1e-7), (loss2, ref2)

    print("KERNEL_OK")
</pallas_src>

<mosaic_0001>
module attributes {stable_mosaic.version = 11 : i64} {
  func.func @_gram_kernel(%arg0: i32, %arg1: memref<8x256xbf16, #tpu.memory_space<vmem>>, %arg2: memref<8x8xf32, #tpu.memory_space<vmem>>) attributes {dimension_semantics = [#tpu.dimension_semantics<arbitrary>], iteration_bounds = array<i64: 1>, scalar_prefetch = 0 : i64, scratch_operands = 0 : i64, tpu.core_type = #tpu.core_type<tc>, window_params = [{transform_indices = @transform_0, window_bounds = array<i64: 8, 256>}, {pipeline_mode = #tpu.pipeline_mode<synchronous>, transform_indices = @transform_1, window_bounds = array<i64: 8, 8>}]} {
    %c0_i32 = arith.constant 0 : i32
    %0 = arith.cmpi eq, %arg0, %c0_i32 : i32
    %1 = arith.extui %0 : i1 to i32
    %c0_i32_0 = arith.constant 0 : i32
    %2 = arith.cmpi ne, %1, %c0_i32_0 : i32
    scf.if %2 {
      %cst_8 = arith.constant 0.000000e+00 : f32
      %11 = vector.broadcast %cst_8 : f32 to vector<8x8xf32>
      %c0_9 = arith.constant 0 : index
      %c0_10 = arith.constant 0 : index
      %12 = vector.load %arg2[%c0_9, %c0_10] : memref<8x8xf32, #tpu.memory_space<vmem>>, vector<8x8xf32>
      tpu.vector_store %arg2[%c0_9, %c0_10], %11 {strides = array<i32>} : memref<8x8xf32, #tpu.memory_space<vmem>>, vector<8x8xf32>,
    } else {
    }
    %c0 = arith.constant 0 : index
    %c0_1 = arith.constant 0 : index
    %3 = vector.load %arg1[%c0, %c0_1] : memref<8x256xbf16, #tpu.memory_space<vmem>>, vector<8x256xbf16>
    %c0_2 = arith.constant 0 : index
    %c0_3 = arith.constant 0 : index
    %4 = vector.load %arg2[%c0_2, %c0_3] : memref<8x8xf32, #tpu.memory_space<vmem>>, vector<8x8xf32>
    %cst = arith.constant dense<0.000000e+00> : vector<8x8xf32>
    %5 = tpu.matmul %3, %3, %cst {dimension_numbers = #tpu.dot_dimension_numbers<[1], [1], [0], [0], [0, 0, 1, 0], [], []>} : vector<8x256xbf16>, vector<8x256xbf16>, vector<8x8xf32> -> vector<8x8xf32>
    %6 = arith.addf %4, %5 : vector<8x8xf32>
    %c0_4 = arith.constant 0 : index
    %c0_5 = arith.constant 0 : index
    %7 = vector.load %arg2[%c0_4, %c0_5] : memref<8x8xf32, #tpu.memory_space<vmem>>, vector<8x8xf32>
    tpu.vector_store %arg2[%c0_4, %c0_5], %6 {strides = array<i32>} : memref<8x8xf32, #tpu.memory_space<vmem>>, vector<8x8xf32>,
    %c0_i32_6 = arith.constant 0 : i32
    %8 = arith.cmpi eq, %arg0, %c0_i32_6 : i32
    %9 = arith.extui %8 : i1 to i32
    %c0_i32_7 = arith.constant 0 : i32
    %10 = arith.cmpi ne, %9, %c0_i32_7 : i32
    scf.if %10 {
      %c0_8 = arith.constant 0 : index
      %c0_9 = arith.constant 0 : index
      %11 = vector.load %arg2[%c0_8, %c0_9] : memref<8x8xf32, #tpu.memory_space<vmem>>, vector<8x8xf32>
      %cst_10 = arith.constant 4.8828125E-4 : f32
      %12 = vector.broadcast %cst_10 : f32 to vector<8x8xf32>
      %13 = arith.mulf %11, %12 : vector<8x8xf32>
      %c0_11 = arith.constant 0 : index
      %c0_12 = arith.constant 0 : index
      %14 = vector.load %arg2[%c0_11, %c0_12] : memref<8x8xf32, #tpu.memory_space<vmem>>, vector<8x8xf32>
      tpu.vector_store %arg2[%c0_11, %c0_12], %13 {strides = array<i32>} : memref<8x8xf32, #tpu.memory_space<vmem>>, vector<8x8xf32>,
    } else {
    }
    return
  }
  func.func @transform_0(%arg0: i32) -> (i32, i32) {
    %c0_i32 = arith.constant 0 : i32
    %c0_i32_0 = arith.constant 0 : i32
    return %c0_i32, %arg0 : i32, i32
  }
  func.func @transform_1(%arg0: i32) -> (i32, i32) {
    %c0_i32 = arith.constant 0 : i32
    %c0_i32_0 = arith.constant 0 : i32
    %c0_i32_1 = arith.constant 0 : i32
    return %c0_i32, %c0_i32_0 : i32, i32
  }
}

</mosaic_0001>

<bundles_post_ra>
// kernel: gram_matrix.1
= control target key start
LH: loop header
LB: loop body
LE: loop exit
PB: predicated region body
PF: predicated region fallthrough
CT: control target
= control target key end

     0   :  { %vm14_vm0 = vcmask 64512   ;;  %s148_s0 = inlined_call_operand.vmem [shape: bf16[8,256], index: 0, kind: input, shape index: {}]   ;;  %s149_s1 = inlined_call_operand.hbm [shape: f32[8,8], index: 1, kind: output, shape index: {}]  }
   0x1   :  { %v16_v0 = vld [vmem:[%s148_s0] sm:$0xff] }
   0x2   :  { %6 = vsyncpa [#allocation3], 0  ;;  %v89_v1 = vcombine.high %v16_v0, %v16_v0  ;;  %v88_v2 = vcombine.low %v16_v0, %v16_v0  ;;  %v118_v3 = vmov 0.0   ;;  %s119_s0 = smov [#allocation2]  }
   0x3   :  { %15 = vst.msk [vmem:[#allocation2] sm:$0xff] %vm14_vm0, %v118_v3  ;;  %s80_s8 = sshll.u32 %s119_s0, 4  ;;  %s81_s8 = int_to_ptr.vmem [resolvable:$true] %s80_s8 }
   0x4   :  { %25 = vmatprep.subr.bf16.mxu0 %v89_v1  ;;  %57 = vmatprep.mubr.bf16.mxu0 %v89_v1  ;;  %s94_s9 = scalar_lea.vmem %s81_s8, 128  ;;  %p99_p1 = scmp.lt.s32.totalorder %s81_s8, %s81_s8 }
   0x5   :  { %26 = vmatpush1.bf16.xpose.msra.mxu0 %v88_v2  ;;  %p95_p0 = scmp.ne.s32.totalorder %s81_s8, %s94_s9  ;;  %p100_p2 = scmp.lt.s32.totalorder %s94_s9, %s94_s9 }
   0x7   :  { %p101_p3 = por %p100_p2, %p99_p1 }
   0x9   :  { %p102_p4 = pnand %p101_p3, %p95_p0 }
   0xa   :  { %v17_v4 = vld [vmem:[#allocation2] sm:$0xff] }
   0xc   :  { %58 = vmatmul.mubr.bf16.vlgmr.msra.gmra.mrb[0].mxu0 %v88_v2 }
  0xdf   :  { %v59_v5 = vpop.f32.mrb[0].mxu0 }
  0xe0   :  { %v65_v6 = vadd.f32 %v59_v5, %v17_v4  ;;  %v61_v7 = vpop.f32.mrb[1].mxu0 }
  0xe1   :  { %v62_v8 = vpop.f32.mrb[2].mxu0 }
  0xe2   :  { %67 = vst.msk [vmem:[#allocation2] sm:$0xff] %vm14_vm0, %v65_v6  ;;  %v63_v9 = vpop.f32.mrb[3].mxu0 }
  0xe9   :  { %v71_v10 = vld [vmem:[#allocation2] sm:$0xff] }
  0xea   :  { %v72_v11 = vmul.f32 0.00048828125, %v71_v10 }
  0xec   :  { %73 = vst.msk [vmem:[#allocation2] sm:$0xff] %vm14_vm0, %v72_v11 }
  0xed   :  { %105 = shalt.err (!%p102_p4)
}
  0xee   :  { %s106_s12 = scalar_lea.hbm %s149_s1, 128 }
  0xef   :  { %p107_p5 = scmp.ne.s32.totalorder %s149_s1, %s106_s12  ;;  %p110_p6 = scmp.lt.u32.totalorder %s106_s12, %s149_s1 }
  0xf1   :  { %p112_p7 = pnand %p110_p6, %p107_p5 }
  0xf3   :  { %115 = shalt.err (!%p112_p7)
}
  0xf4   :  { %83 = dma.vmem_to_hbm [thread:$0]  %s81_s8, 128, %s149_s1, [#allocation3]  }
  0xf5   :  { %116 = dma.done.wait [#allocation3], 128  }
  0xf6   :  { %117 = vsyncadd [#allocation3], 4294967168 }
  0xf7   :  { %87 = vsyncpa [#allocation3], 1 }

</bundles_post_ra>
